<compile_context>
chip_gen: v5e
topology: v5e:2x2
jax: 0.10.0
libtpu: 0.0.40
codegen_flags: <defaults>
</compile_context>

<pallas_src>
import jax
import jax.numpy as jnp
from jax.experimental import pallas as pl
from jax.experimental.pallas import tpu as pltpu

_MiB = 1024 * 1024


def _round_up(x, m):
    return ((x + m - 1) // m) * m


def _chip_block_policy():
    """Per-generation (per-input block byte budget, scoped-VMEM limit in bytes)."""
    kind = ""
    try:
        kind = jax.devices()[0].device_kind.lower()
    except Exception:
        pass
    if "v4" in kind or "v5" in kind:
        # v5e: 16 MiB scoped-VMEM default, ~820 GB/s -> ~3 MiB blocks already
        # amortize the ~0.35us per-step overhead; raise the limit for safety.
        return 3 * _MiB, 48 * _MiB
    if "v6" in kind:
        # v6e: 128 MiB physical VMEM -> big slabs + raised scoped limit.
        return 8 * _MiB, 64 * _MiB
    if "v7" in kind or "7x" in kind:
        # v7x: ~3.2 TB/s HBM wants big slabs, but only 64 MiB physical VMEM.
        return 8 * _MiB, 48 * _MiB
    return 4 * _MiB, 48 * _MiB


def _choose_tm(n_rows, n_cols, itemsize, budget_bytes):
    """Row-block size: multiple of 8 sublanes, capped by the per-input byte
    budget, and small enough that mid/large tables get >=2 (>=4) blocks."""
    if n_rows <= 8:
        return n_rows                                   # full extent, one tiny block
    bytes_per_row = max(1, n_cols * itemsize)
    tm = max(8, (budget_bytes // bytes_per_row) // 8 * 8)
    # TODO(synk): tile K as a second grid axis if a single 8-row block exceeds VMEM.
    table_bytes = n_rows * bytes_per_row
    if table_bytes > 4 * _MiB:
        min_blocks = 4
    elif table_bytes > 1 * _MiB:
        min_blocks = 2
    else:
        min_blocks = 1
    if min_blocks > 1:
        tm = min(tm, max(8, _round_up(pl.cdiv(n_rows, min_blocks), 8)))
    return min(tm, _round_up(n_rows, 8))


def _make_l1_kernel(tm, n_rows, needs_mask, weighted):
    """Kernel over one (tm, K) block; writes the block's partial |diff| sum as a
    dense (8,128) f32 tile (value splat across the tile)."""

    def kernel(*refs):
        if weighted:
            pred_ref, gt_ref, w_ref, out_ref = refs
        else:
            pred_ref, gt_ref, out_ref = refs

        p = pred_ref[...]
        g = gt_ref[...]
        if (not weighted) and p.dtype == jnp.bfloat16:
            # Keep bf16 math in bf16 (halves vreg pressure); accumulate in f32.
            absd = jnp.abs(p - g)
        else:
            p = p.astype(jnp.float32)
            g = g.astype(jnp.float32)
            d = p - g
            if weighted:
                # |w*pred - w*gt| == |w*(pred-gt)| : apply the weight once.
                d = d * w_ref[...].astype(jnp.float32)   # (tm,1) broadcasts over K
            absd = jnp.abs(d)

        if needs_mask:
            # Last grid block may extend past the true row count: zero those rows.
            row0 = pl.program_id(0) * tm
            rows = jax.lax.broadcasted_iota(jnp.int32, (tm, 1), 0) + row0
            absd = jnp.where(rows < n_rows, absd, jnp.array(0, absd.dtype))

        total = jnp.sum(absd, dtype=jnp.float32)          # one full reduce per block
        out_ref[...] = jnp.full((8, 128), total, dtype=jnp.float32)

    return kernel


def per_joint_l1_loss(output, target, use_target_weight=False, target_weight=None):
    """Pallas TPU implementation of PerJointL1Loss.forward.

    output, target: (B, J, ...) arrays of identical shape.
    target_weight:  broadcastable to (B, J, 1) when use_target_weight=True.
    Returns a scalar f32 = mean(|w*pred - w*gt|) (w == 1 when unweighted)."""
    assert output.shape == target.shape
    B = output.shape[0]
    J = output.shape[1] if output.ndim > 1 else 1
    K = 1
    for d in output.shape[2:]:
        K *= d
    R = B * J
    n_elems = R * K

    pred = output.reshape(R, K)                 # free reshape, no transpose / extra HBM pass
    gt = target.reshape(R, K)

    itemsize = jnp.dtype(output.dtype).itemsize
    budget, vmem_limit = _chip_block_policy()
    tm = _choose_tm(R, K, itemsize, budget)
    num_blocks = pl.cdiv(R, tm)
    needs_mask = (num_blocks * tm != R)

    in_specs = [pl.BlockSpec((tm, K), lambda i: (i, 0)),
                pl.BlockSpec((tm, K), lambda i: (i, 0))]
    args = [pred, gt]
    if use_target_weight:
        w = target_weight.astype(jnp.float32).reshape(R, 1)
        in_specs.append(pl.BlockSpec((tm, 1), lambda i: (i, 0)))
        args.append(w)

    kernel = _make_l1_kernel(tm, R, needs_mask, use_target_weight)

    cost = pl.CostEstimate(
        flops=(4 if use_target_weight else 3) * n_elems,
        transcendentals=0,
        bytes_accessed=2 * n_elems * itemsize
        + (R * 4 if use_target_weight else 0)
        + num_blocks * 8 * 128 * 4,
    )

    partials = pl.pallas_call(
        kernel,
        out_shape=jax.ShapeDtypeStruct((num_blocks * 8, 128), jnp.float32),
        grid_spec=pltpu.PrefetchScalarGridSpec(
            num_scalar_prefetch=0,
            grid=(num_blocks,),
            in_specs=in_specs,
            out_specs=pl.BlockSpec((8, 128), lambda i: (i, 0)),
        ),
        compiler_params=pltpu.CompilerParams(
            dimension_semantics=("parallel",),          # independent partials -> megacore
            vmem_limit_bytes=vmem_limit,
        ),
        cost_estimate=cost,
    )(*args)

    block_sums = partials[::8, 0]                        # one partial per grid block
    return jnp.sum(block_sums) / jnp.float32(n_elems)    # L1Loss(reduction='mean')


def per_joint_l1_loss_reference(output, target, use_target_weight=False, target_weight=None):
    """Pure-JAX reference reproducing the PyTorch module semantics."""
    if use_target_weight:
        B, J = output.shape[0], output.shape[1]
        pred = output.reshape(B, J, -1)
        gt = target.reshape(B, J, -1)
        return jnp.mean(jnp.abs(pred * target_weight - gt * target_weight))
    return jnp.mean(jnp.abs(output - target))


if __name__ == "__main__":
    key = jax.random.PRNGKey(0)
    k1, k2, k3 = jax.random.split(key, 3)

    B, J, H, W = 2, 4, 16, 16                            # batch, num_joints, heatmap spatial
    output = jax.random.normal(k1, (B, J, H, W), dtype=jnp.float32)
    target = jax.random.normal(k2, (B, J, H, W), dtype=jnp.float32)
    target_weight = jax.random.uniform(k3, (B, J, 1), dtype=jnp.float32)

    # use_target_weight = False path
    loss_plain = jax.block_until_ready(per_joint_l1_loss(output, target))
    ref_plain = per_joint_l1_loss_reference(output, target)
    assert jnp.allclose(loss_plain, ref_plain, rtol=1e-5, atol=1e-6), (loss_plain, ref_plain)

    # use_target_weight = True path
    loss_w = jax.block_until_ready(
        per_joint_l1_loss(output, target, use_target_weight=True, target_weight=target_weight))
    ref_w = per_joint_l1_loss_reference(output, target, True, target_weight)
    assert jnp.allclose(loss_w, ref_w, rtol=1e-5, atol=1e-6), (loss_w, ref_w)

    print("KERNEL_OK")
</pallas_src>

<mosaic_0001>
module attributes {stable_mosaic.version = 11 : i64} {
  func.func @kernel(%arg0: i32, %arg1: memref<8x256xf32, #tpu.memory_space<vmem>>, %arg2: memref<8x256xf32, #tpu.memory_space<vmem>>, %arg3: memref<8x128xf32, #tpu.memory_space<vmem>>) attributes {dimension_semantics = [#tpu.dimension_semantics<parallel>], iteration_bounds = array<i64: 1>, scalar_prefetch = 0 : i64, scratch_operands = 0 : i64, tpu.core_type = #tpu.core_type<tc>, window_params = [{transform_indices = @transform_0, window_bounds = array<i64: 8, 256>}, {transform_indices = @transform_1, window_bounds = array<i64: 8, 256>}, {transform_indices = @transform_2, window_bounds = array<i64: 8, 128>}]} {
    %c0 = arith.constant 0 : index
    %c0_0 = arith.constant 0 : index
    %0 = vector.load %arg1[%c0, %c0_0] : memref<8x256xf32, #tpu.memory_space<vmem>>, vector<8x256xf32>
    %c0_1 = arith.constant 0 : index
    %c0_2 = arith.constant 0 : index
    %1 = vector.load %arg2[%c0_1, %c0_2] : memref<8x256xf32, #tpu.memory_space<vmem>>, vector<8x256xf32>
    %2 = arith.subf %0, %1 : vector<8x256xf32>
    %3 = math.absf %2 : vector<8x256xf32>
    %4 = vector.shape_cast %3 : vector<8x256xf32> to vector<1x8x256xf32>
    %cst = arith.constant dense<0.000000e+00> : vector<1xf32>
    %5 = vector.multi_reduction <add>, %4, %cst [1, 2] : vector<1x8x256xf32> to vector<1xf32>
    %6 = vector.shape_cast %5 : vector<1xf32> to vector<1x1x1xf32>
    %7 = vector.extract %6[0, 0, 0] : f32 from vector<1x1x1xf32>
    %8 = vector.broadcast %7 : f32 to vector<8x128xf32>
    %c0_3 = arith.constant 0 : index
    %c0_4 = arith.constant 0 : index
    %9 = vector.load %arg3[%c0_3, %c0_4] : memref<8x128xf32, #tpu.memory_space<vmem>>, vector<8x128xf32>
    tpu.vector_store %arg3[%c0_3, %c0_4], %8 {strides = array<i32>} : memref<8x128xf32, #tpu.memory_space<vmem>>, vector<8x128xf32>,
    return
  }
  func.func @transform_0(%arg0: i32) -> (i32, i32) {
    %c0_i32 = arith.constant 0 : i32
    %c0_i32_0 = arith.constant 0 : i32
    return %arg0, %c0_i32 : i32, i32
  }
  func.func @transform_1(%arg0: i32) -> (i32, i32) {
    %c0_i32 = arith.constant 0 : i32
    %c0_i32_0 = arith.constant 0 : i32
    return %arg0, %c0_i32 : i32, i32
  }
  func.func @transform_2(%arg0: i32) -> (i32, i32) {
    %c0_i32 = arith.constant 0 : i32
    %c0_i32_0 = arith.constant 0 : i32
    return %arg0, %c0_i32 : i32, i32
  }
}

</mosaic_0001>

<bundles_post_ra>
// kernel: tpu_custom_call.1
= control target key start
LH: loop header
LB: loop body
LE: loop exit
PB: predicated region body
PF: predicated region fallthrough
CT: control target
= control target key end

     0   :  { %7 = vsyncpa [#allocation3], 0  ;;  %s188_s0 = inlined_call_operand.hbm [shape: f32[8,256], index: 0, kind: input, shape index: {}]   ;;  %s189_s1 = inlined_call_operand.hbm [shape: f32[8,256], index: 1, kind: input, shape index: {}]   ;;  %s190_s2 = inlined_call_operand.hbm [shape: f32[8,128], index: 2, kind: output, shape index: {}]  }
   0x1   :  { %8 = vsyncpa [#allocation6], 0 }
   0x2   :  { %9 = vsyncpa [#allocation4], 0  ;;  %s15_s11 = sshll.u32 %s188_s0, 4  ;;  %s161_s12 = smov [#allocation2]   ;;  %s16_s11 = int_to_ptr.hbm [resolvable:$true] %s15_s11 }
   0x3   :  { %s17_s13 = sshll.u32 %s161_s12, 4  ;;  %s26_s16 = sshll.u32 %s189_s1, 4  ;;  %s18_s13 = int_to_ptr.vmem [resolvable:$true] %s17_s13  ;;  %s27_s16 = int_to_ptr.hbm [resolvable:$true] %s26_s16 }
   0x4   :  { %20 = dma.hbm_to_vmem [thread:$0]  %s16_s11, 256, %s18_s13, [#allocation3]  }
   0x5   :  { %s162_s17 = smov [#allocation5]  }
   0x6   :  { %s28_s18 = sshll.u32 %s162_s17, 4  ;;  %s29_s18 = int_to_ptr.vmem [resolvable:$true] %s28_s18 }
   0x7   :  { %31 = dma.hbm_to_vmem [thread:$0]  %s27_s16, 256, %s29_s18, [#allocation6]  }
   0x8   :  { %155 = dma.done.wait [#allocation3], 256  }
   0x9   :  { %156 = vsyncadd [#allocation3], 4294967040 }
   0xa   :  { %157 = dma.done.wait [#allocation6], 256  }
   0xb   :  { %158 = vsyncadd [#allocation6], 4294967040  ;;  %v40_v0 = vld [vmem:[#allocation2] sm:$0xff]  ;;  %v41_v1 = vld [vmem:[#allocation2 + $0x8] sm:$0xff]  ;;  %s163_s0 = smov [#allocation7]   ;;  %s67_s21 = sshll.u32 %s190_s2, 4  ;;  %s68_s21 = int_to_ptr.hbm [resolvable:$true] %s67_s21 }
   0xc   :  { %v42_v2 = vld [vmem:[#allocation5] sm:$0xff]  ;;  %v43_v3 = vld [vmem:[#allocation5 + $0x8] sm:$0xff]  ;;  %s65_s1 = sshll.u32 %s163_s0, 4  ;;  %s66_s1 = int_to_ptr.vmem [resolvable:$true] %s65_s1 }
   0xd   :  { %v44_v4 = vsub.f32 %v40_v0, %v42_v2  ;;  %v45_v5 = vsub.f32 %v41_v1, %v43_v3 }
   0xf   :  { %v46_v6 = vand.u32 2147483647, %v44_v4  ;;  %v47_v7 = vand.u32 2147483647, %v45_v5 }
  0x11   :  { %v48_v8 = vadd.f32 %v47_v7, %v46_v6 }
  0x13   :  { %49 = vadd.xlane.f32.xlu0 %v48_v8 }
  0x86   :  { %v50_v9 = vpop.xlane.xlu0 %49 }
  0x87   :  { %v51_v10 = vrot.slane %v50_v9, 4 }
  0x89   :  { %v52_v11 = vadd.f32 %v51_v10, %v50_v9 }
  0x8b   :  { %v53_v12 = vrot.slane %v52_v11, 2 }
  0x8d   :  { %v54_v13 = vadd.f32 %v53_v12, %v52_v11 }
  0x8f   :  { %v55_v14 = vrot.slane %v54_v13, 1 }
  0x91   :  { %v56_v15 = vadd.f32 %v55_v14, %v54_v13 }
  0x93   :  { %78 = vpush %v56_v15 }
  0xc4   :  { %s79_s22 = spop %78 }
  0xc5   :  { %v58_v16 = vstv %s79_s22 }
  0xc6   :  { %59 = vst [vmem:[#allocation7] sm:$0xff] %v58_v16 }
  0xc7   :  { %70 = dma.vmem_to_hbm [thread:$0]  %s66_s1, 128, %s68_s21, [#allocation4]  }
  0xc8   :  { %159 = dma.done.wait [#allocation4], 128  }
  0xc9   :  { %160 = vsyncadd [#allocation4], 4294967168 }
  0xca   :  { %75 = vsyncpa [#allocation3], 1 }
  0xcb   :  { %76 = vsyncpa [#allocation6], 1 }
  0xcc   :  { %77 = vsyncpa [#allocation4], 1 }

</bundles_post_ra>
